<compile_context>
chip_gen: v5e
topology: v5e:2x2
jax: 0.10.0
libtpu: 0.0.40
codegen_flags: <defaults>
</compile_context>

<pallas_src>
import jax
import jax.numpy as jnp
from jax.experimental import pallas as pl
from jax.experimental.pallas import tpu as pltpu


def _linear_conv_kernel(x_ref, w_ref, b_ref, o_ref):
    # x_ref: (C_in, ts)   w_ref: (C_out, C_in)   b_ref: (C_out, 1)
    # o_ref: (C_out, ts)
    x = x_ref[...].astype(jnp.float32)
    w = w_ref[...].astype(jnp.float32)
    y = jnp.dot(w, x,
                preferred_element_type=jnp.float32,
                precision=jax.lax.Precision.HIGHEST)
    y = y + b_ref[...].astype(jnp.float32)
    o_ref[...] = y.astype(o_ref.dtype)


def _pick_tile_cols(S, C_in, C_out, itemsize,
                    vmem_budget_bytes=12 * 1024 * 1024):
    """Largest lane-dense column tile that keeps double-buffered blocks in budget."""
    if S % 128 != 0:
        # Full-extent block along the lane axis (Pallas allows full-dim blocks).
        return S
    # double-buffered input + output blocks, plus f32 temporaries in the body
    bytes_per_col = (C_in + C_out) * itemsize * 2 + (C_in + C_out) * 4
    max_cols = max(128, vmem_budget_bytes // max(bytes_per_col, 1))
    max_cols = (max_cols // 128) * 128
    return min(S, max_cols, 8192)


def linear_conv(x, weight, bias, *, vmem_limit_bytes=48 * 1024 * 1024):
    """Equivalent of LinearConv.forward: linear over channel dim 1 of x."""
    assert x.ndim >= 2
    B, C_in = x.shape[0], x.shape[1]
    spatial = x.shape[2:]
    C_out = weight.shape[0]
    assert weight.shape == (C_out, C_in)
    assert bias.shape == (C_out,)

    S = 1
    for d in spatial:
        S *= d
    x3 = x.reshape(B, C_in, S)

    ts = _pick_tile_cols(S, C_in, C_out, jnp.dtype(x.dtype).itemsize)
    grid = (B, pl.cdiv(S, ts))

    # Bias as a (C_out, 1) column so it broadcasts over the lane (spatial) axis.
    b2 = bias.reshape(C_out, 1)

    # TODO(synk): for very large C_in*C_out the weight should itself be tiled
    # over an extra grid axis; kept fully resident here (typical 1x1-conv sizes).
    out = pl.pallas_call(
        _linear_conv_kernel,
        out_shape=jax.ShapeDtypeStruct((B, C_out, S), x.dtype),
        grid_spec=pltpu.PrefetchScalarGridSpec(
            num_scalar_prefetch=0,
            grid=grid,
            in_specs=[
                # batch dim squeezed out of the kernel view
                pl.BlockSpec((None, C_in, ts), lambda b, s: (b, 0, s)),
                pl.BlockSpec((C_out, C_in), lambda b, s: (0, 0)),
                pl.BlockSpec((C_out, 1), lambda b, s: (0, 0)),
            ],
            out_specs=pl.BlockSpec((None, C_out, ts), lambda b, s: (b, 0, s)),
        ),
        compiler_params=pltpu.CompilerParams(
            dimension_semantics=("parallel", "parallel"),
            vmem_limit_bytes=vmem_limit_bytes,
        ),
    )(x3, weight, b2)

    return out.reshape((B, C_out) + spatial)


if __name__ == "__main__":
    # Shapes implied by the module: x = (batch, in_dim, H, W), 1x1-conv-like linear.
    batch, in_dim, out_dim, H, W = 2, 4, 8, 16, 16

    key = jax.random.PRNGKey(0)
    kx, kw, kb = jax.random.split(key, 3)
    x = jax.random.normal(kx, (batch, in_dim, H, W), dtype=jnp.float32)
    weight = jax.random.normal(kw, (out_dim, in_dim), dtype=jnp.float32) * 0.1
    bias = jax.random.normal(kb, (out_dim,), dtype=jnp.float32) * 0.1

    y = linear_conv(x, weight, bias)
    y = jax.block_until_ready(y)

    # Reference: linear(x.transpose(1,-1)).transpose(1,-1) == einsum over dim 1.
    ref = jnp.einsum("oi,bihw->bohw", weight, x,
                     precision=jax.lax.Precision.HIGHEST) \
          + bias[None, :, None, None]

    assert y.shape == ref.shape, (y.shape, ref.shape)
    assert jnp.allclose(y, ref, atol=1e-4, rtol=1e-4), "mismatch vs reference"

    print("KERNEL_OK")
</pallas_src>

<mosaic_0001>
module attributes {stable_mosaic.version = 11 : i64} {
  func.func @_linear_conv_kernel(%arg0: i32, %arg1: i32, %arg2: memref<1x4x256xf32, #tpu.memory_space<vmem>>, %arg3: memref<8x4xf32, #tpu.memory_space<vmem>>, %arg4: memref<8x1xf32, #tpu.memory_space<vmem>>, %arg5: memref<1x8x256xf32, #tpu.memory_space<vmem>>) attributes {dimension_semantics = [#tpu.dimension_semantics<parallel>, #tpu.dimension_semantics<parallel>], iteration_bounds = array<i64: 2, 1>, scalar_prefetch = 0 : i64, scratch_operands = 0 : i64, tpu.core_type = #tpu.core_type<tc>, window_params = [{transform_indices = @transform_0, window_bounds = array<i64: 1, 4, 256>}, {pipeline_mode = #tpu.pipeline_mode<synchronous>, transform_indices = @transform_1, window_bounds = array<i64: 8, 4>}, {pipeline_mode = #tpu.pipeline_mode<synchronous>, transform_indices = @transform_2, window_bounds = array<i64: 8, 1>}, {transform_indices = @transform_3, window_bounds = array<i64: 1, 8, 256>}]} {
    %c0 = arith.constant 0 : index
    %c0_0 = arith.constant 0 : index
    %c0_1 = arith.constant 0 : index
    %0 = vector.load %arg2[%c0, %c0_0, %c0_1] : memref<1x4x256xf32, #tpu.memory_space<vmem>>, vector<1x4x256xf32>
    %1 = vector.shape_cast %0 : vector<1x4x256xf32> to vector<4x256xf32>
    %c0_2 = arith.constant 0 : index
    %c0_3 = arith.constant 0 : index
    %2 = vector.load %arg3[%c0_2, %c0_3] : memref<8x4xf32, #tpu.memory_space<vmem>>, vector<8x4xf32>
    %cst = arith.constant dense<0.000000e+00> : vector<8x256xf32>
    %3 = tpu.matmul %2, %1, %cst {dimension_numbers = #tpu.dot_dimension_numbers<[1], [0], [0], [1], [0, 0, 1, 1], [], []>, precision = #tpu.contract_precision<fp32>} : vector<8x4xf32>, vector<4x256xf32>, vector<8x256xf32> -> vector<8x256xf32>
    %c0_4 = arith.constant 0 : index
    %c0_5 = arith.constant 0 : index
    %4 = vector.load %arg4[%c0_4, %c0_5] : memref<8x1xf32, #tpu.memory_space<vmem>>, vector<8x1xf32>
    %5 = vector.broadcast %4 : vector<8x1xf32> to vector<8x256xf32>
    %6 = arith.addf %3, %5 : vector<8x256xf32>
    %c0_6 = arith.constant 0 : index
    %c0_7 = arith.constant 0 : index
    %c0_8 = arith.constant 0 : index
    %7 = vector.load %arg5[%c0_6, %c0_7, %c0_8] : memref<1x8x256xf32, #tpu.memory_space<vmem>>, vector<1x8x256xf32>
    %8 = vector.shape_cast %7 : vector<1x8x256xf32> to vector<8x256xf32>
    %9 = vector.shape_cast %6 : vector<8x256xf32> to vector<1x8x256xf32>
    tpu.vector_store %arg5[%c0_6, %c0_7, %c0_8], %9 {strides = array<i32>} : memref<1x8x256xf32, #tpu.memory_space<vmem>>, vector<1x8x256xf32>,
    return
  }
  func.func @transform_0(%arg0: i32, %arg1: i32) -> (i32, i32, i32) {
    %c0_i32 = arith.constant 0 : i32
    %c0_i32_0 = arith.constant 0 : i32
    return %arg0, %c0_i32, %arg1 : i32, i32, i32
  }
  func.func @transform_1(%arg0: i32, %arg1: i32) -> (i32, i32) {
    %c0_i32 = arith.constant 0 : i32
    %c0_i32_0 = arith.constant 0 : i32
    %c0_i32_1 = arith.constant 0 : i32
    return %c0_i32, %c0_i32_0 : i32, i32
  }
  func.func @transform_2(%arg0: i32, %arg1: i32) -> (i32, i32) {
    %c0_i32 = arith.constant 0 : i32
    %c0_i32_0 = arith.constant 0 : i32
    %c0_i32_1 = arith.constant 0 : i32
    return %c0_i32, %c0_i32_0 : i32, i32
  }
  func.func @transform_3(%arg0: i32, %arg1: i32) -> (i32, i32, i32) {
    %c0_i32 = arith.constant 0 : i32
    %c0_i32_0 = arith.constant 0 : i32
    return %arg0, %c0_i32, %arg1 : i32, i32, i32
  }
}

</mosaic_0001>

<bundles_post_ra>
// kernel: tpu_custom_call.1
= control target key start
LH: loop header
LB: loop body
LE: loop exit
PB: predicated region body
PF: predicated region fallthrough
CT: control target
= control target key end

     0   :  { %8 = vsyncpa [#allocation3], 0  ;;  %s886_s0 = inlined_call_operand.vmem [shape: f32[2,4,256], index: 0, kind: input, shape index: {}]   ;;  %s887_s1 = inlined_call_operand.vmem [shape: f32[8,4], index: 1, kind: input, shape index: {}]   ;;  %s888_s2 = inlined_call_operand.vmem [shape: f32[8,1], index: 2, kind: input, shape index: {}]   ;;  %s889_s3 = inlined_call_operand.hbm [shape: f32[2,8,256], index: 3, kind: output, shape index: {}]  }
   0x1   :  { %10 = vsyncpa [#allocation3 + $0x1], 0  ;;  %s783_s12 = smov 0   ;;  %s785_s13 = smov 0  }
   0x2   :  { %s787_s14 = smov 0   ;;  %s789_s15 = smov 0  }
   0x3   :  { %s791_s16 = smov 0   ;;  %s793_s17 = smov 0  }
   0x4 LB: > { %s610_s18 = sadd.s32 4294967295, %s760_s17   ;;  %s611_s19 = sadd.s32 4294967294, %s760_s17   ;;  %s760_s17 = sphi %s793_s17, %s16_s17   ;;  %s756_s16 = sphi %s791_s16, %s896_s16   ;;  %s752_s15 = sphi %s789_s15, %s895_s15   ;;  %s748_s14 = sphi %s787_s14, %s894_s14   ;;  %s744_s13 = sphi %s785_s13, %s893_s13   ;;  %s740_s12 = sphi %s783_s12, %s892_s12  }
   0x5   : > { %s28_s20 = sadd.s32 1, %s756_s16  ;;  %s107_s21 = sadd.s32 1, %s748_s14 }
   0x6   : > { %p30_p0 = scmp.ge.s32.totalorder %s28_s20, 2  ;;  %p117_p1 = scmp.ne.s32.totalorder %s748_s14, %s744_s13 }
   0x7   : > { %p118_p2 = scmp.eq.s32.totalorder %s610_s18, 1  ;;  %p123_p3 = scmp.ne.s32.totalorder %s744_s13, %s740_s12 }
   0x8   : > { %s898_s20 = smov (%p30_p0, %s28_s20), 0  ;;  %p124_p5 = scmp.eq.s32.totalorder %s611_s19, 1 }
   0x9   : > { %p823_p4 = por %p118_p2, %p117_p1  ;;  %s102_s23 = ssub.s32 %s756_s16, %s898_s20 }
   0xa   : > { %p614_p6 = scmp.ge.s32.totalorder %s760_s17, 1  ;;  %p105_p7 = scmp.eq.s32.totalorder %s102_s23, 0 }
   0xb   : > { %p830_p8 = por %p124_p5, %p123_p3  ;;  %p161_p9 = scmp.lt.s32.totalorder %s760_s17, 3 }
   0xc   : > { %s836_s25 = scalar_select %p105_p7, %s748_s14, %s107_s21  }
   0xd   : > { %p162_p10 = pnand %p614_p6, %p161_p9 }
   0xe   : > { %p190_p11 = scmp.lt.s32.totalorder (!%p162_p10), %s752_s15, 1  ;;  %s186_s8 = sand.u32 (!%p162_p10), 1, %s744_s13  }
   0xf   : > { %165 = sbr.rel (%p162_p10) target bundleno = 196 (0xc4), region = 32  ;;  %s615_s9 = sshll.u32 (!%p162_p10), %s186_s8, 4 }
  0x10   : > { %s188_s10 = scalar_lea.vmem (!%p162_p10), [#allocation2], %s615_s9  ;;  %s624_s11 = sshll.u32 (!%p162_p10), %s752_s15, 4 }
  0x11   : > { %s529_s21 = scalar_lea.hbm (!%p162_p10), %s889_s3, %s624_s11  ;;  %s531_s23 = sshll.u32 (!%p162_p10), %s188_s10, 4  ;;  %s532_s23 = int_to_ptr.vmem [resolvable:$true] %s531_s23 }
  0x12   : > { %s533_s26 = sshll.u32 (!%p162_p10), %s529_s21, 4  ;;  %s516_s27 = scalar_lea.sflag (!%p162_p10), [#allocation3], %s186_s8  ;;  %s534_s26 = int_to_ptr.hbm [resolvable:$true] %s533_s26 }
  0x14   : > { %v201_v0 = vld [vmem:[%s887_s1] sm:$0xff]  ;;  %vm212_vm0 = vcmask 31744   ;;  %v762_v2 = vmov 0   ;;  %s191_s28 = scalar_select %p190_p11, %s752_s15, 1  ;;  %vm216_vm1 = vcmask 1043456  }
  0x15   : > { %v214_v1 = vsel %vm212_vm0, %v201_v0, 0  ;;  %681 = vset.pattern.permute.xlu0 %v762_v2  ;;  %v202_v4 = vld [vmem:[%s888_s2] sm:$0xff] }
  0x16   : > { %v238_v3 = vand.u32 4294901760, %v214_v1  ;;  %s623_s4 = sshll.u32 %s191_s28, 3  ;;  %205 = vperm.xlu0 %681, %v202_v4   ;;  %s696_s28 = sshra.s32 %s534_s26, 4  ;;  %s697_s28 = int_to_ptr.hbm [resolvable:$true] %s696_s28 }
  0x17   : > { %s197_s7 = scalar_lea.vmem %s886_s0, %s623_s4  ;;  %s698_s15 = scalar_lea.hbm %s697_s28, 16 }
  0x18   : > { %v239_v5 = vsub.f32 %v214_v1, %v238_v3  ;;  %v200_v6 = vld [vmem:[%s197_s7] sm:$0xff]  ;;  %p699_p12 = scmp.ne.s32.totalorder %s697_s28, %s698_s15  ;;  %s702_s4 = scalar_lea.hbm %s889_s3, 32 }
  0x19   : > { %209 = vst [vmem:[#allocation1] ss:$2 sm:$0xff] %v200_v6  ;;  %p703_p1 = scmp.lt.s32.totalorder %s697_s28, %s889_s3  ;;  %p704_p2 = scmp.lt.s32.totalorder %s702_s4, %s698_s15 }
  0x1a   : > { %v240_v7 = vand.u32 4294901760, %v239_v5  ;;  %p700_p13 = pnand %p699_p12, %p823_p4 }
  0x1b   : > { %p705_p3 = por %p704_p2, %p703_p1 }
  0x1c   : > { %v241_v8 = vsub.f32 %v239_v5, %v240_v7  ;;  %p701_p0 = pneg %p700_p13 }
  0x1e   : > { %v242_v13 = vand.u32 4294901760, %v241_v8  ;;  %p706_p5 = pnand %p705_p3, %p701_p0 }
  0x20   : > { %v210_v9 = vld.sshfl [vmem:[#allocation1] sm:$0xff pattern:$0x75316420]  ;;  %v211_v10 = vld.sshfl [vmem:[#allocation1 + $0x8] sm:$0xff pattern:$0x75316420] }
  0x21   : > { %v217_v11 = vsel %vm216_vm1, %v210_v9, 0  ;;  %v219_v12 = vsel %vm216_vm1, %v211_v10, 0 }
  0x22   : > { %v236_v14 = vand.u32 4294901760, %v217_v11  ;;  %v382_v15 = vand.u32 4294901760, %v219_v12 }
  0x24   : > { %v263_v16 = vsub.f32 %v217_v11, %v236_v14  ;;  %237 = vmatpush.msra.mxu0 %v236_v14  ;;  %313 = vmatpush.msra.mxu3 %v236_v14  ;;  %v409_v17 = vsub.f32 %v219_v12, %v382_v15 }
  0x25   : > { %243 = vmatmul.f32.vlgmr.msra.gmra.mxu0 %v242_v13  ;;  %317 = vmatmul.f32.vlgmr.msra.gmra.mxu3 %v240_v7 }
  0x26   : > { %290 = vmatpush.msra.mxu2 %v263_v16  ;;  %v264_v18 = vand.u32 4294901760, %v263_v16  ;;  %v410_v19 = vand.u32 4294901760, %v409_v17 }
  0x27   : > { %293 = vmatmul.f32.vlgmr.msra.gmra.mxu2 %v239_v5 }
  0x28   : > { %383 = vmatpush.msrb.mxu2 %v382_v15  ;;  %339 = vmatpush.msrb.mxu0 %v264_v18  ;;  %v411_v20 = vsub.f32 %v409_v17, %v410_v19  ;;  %v265_v21 = vsub.f32 %v263_v16, %v264_v18 }
  0x2a   : > { %485 = vmatpush.msra.mxu2 %v410_v19  ;;  %436 = vmatpush.msra.mxu0 %v409_v17  ;;  %v412_v22 = vand.u32 4294901760, %v411_v20  ;;  %v266_v23 = vand.u32 4294901760, %v265_v21 }
  0x2c   : > { %413 = vmatpush.msrb.mxu3 %v412_v22  ;;  %267 = vmatpush.msra.mxu1 %v266_v23 }
  0x2d   : > { %269 = vmatmul.f32.vlgmr.msra.gmra.mxu1 %v238_v3  ;;  %341 = vmatmul.f32.vlgmr.msrb.gmra.mxu0 %v238_v3 }
  0x2e   : > { %361 = vmatpush.msrb.mxu1 %v236_v14  ;;  %415 = vmatmul.f32.vlgmr.msrb.gmra.mxu3 %v238_v3 }
  0x2f   : > { %389 = vmatmul.f32.vlgmr.msrb.gmra.mxu2 %v242_v13  ;;  %507 = vmatpush.msra.mxu3 %v382_v15 }
  0x30   : > { %459 = vmatpush.msra.mxu1 %v382_v15 }
  0x35   : > { %363 = vmatmul.f32.vlgmr.msrb.gmra.mxu1 %v238_v3  ;;  %439 = vmatmul.f32.vlgmr.msra.gmra.mxu0 %v239_v5 }
  0x36   : > { %509 = vmatmul.f32.vlgmr.msra.gmra.mxu3 %v238_v3 }
  0x37   : > { %487 = vmatmul.f32.vlgmr.msra.gmra.mxu2 %v238_v3 }
  0x3d   : > { %463 = vmatmul.f32.vlgmr.msra.gmra.mxu1 %v240_v7 }
  0x88   : > { %v206_v25 = vpop.permute.xlu0 %205 }
  0xa2   : > { %v244_v24 = vpop.f32.mrf.mxu0 }
  0xa3   : > { %v245_v26 = vadd.f32 %v244_v24, %v206_v25 }
  0xa8   : > { %v318_v27 = vpop.f32.mrf.mxu3 }
  0xaa   : > { %v270_v28 = vpop.f32.mrf.mxu1  ;;  %v294_v29 = vpop.f32.mrf.mxu2 }
  0xab   : > { %v271_v30 = vadd.f32 %v270_v28, %v245_v26  ;;  %v342_v31 = vpop.f32.mrf.mxu0 }
  0xad   : > { %v295_v32 = vadd.f32 %v294_v29, %v271_v30 }
  0xaf   : > { %v319_v33 = vadd.f32 %v318_v27, %v295_v32 }
  0xb1   : > { %v343_v34 = vadd.f32 %v342_v31, %v319_v33  ;;  %v416_v35 = vpop.f32.mrf.mxu3 }
  0xb2   : > { %v364_v36 = vpop.f32.mrf.mxu1  ;;  %v390_v37 = vpop.f32.mrf.mxu2 }
  0xb3   : > { %v365_v38 = vadd.f32 %v364_v36, %v343_v34  ;;  %v391_v39 = vadd.f32 %v390_v37, %v206_v25  ;;  %v440_v40 = vpop.f32.mrf.mxu0 }
  0xb5   : > { %513 = vst [vmem:[%s188_s10] sm:$0xff] %v365_v38  ;;  %v417_v41 = vadd.f32 %v416_v35, %v391_v39 }
  0xb7   : > { %v441_v42 = vadd.f32 %v440_v40, %v417_v41 }
  0xb9   : > { %v510_v46 = vpop.f32.mrf.mxu3 }
  0xba   : > { %v464_v43 = vpop.f32.mrf.mxu1  ;;  %v488_v44 = vpop.f32.mrf.mxu2 }
  0xbb   : > { %v465_v45 = vadd.f32 %v464_v43, %v441_v42 }
  0xbd   : > { %v489_v47 = vadd.f32 %v488_v44, %v465_v45 }
  0xbf   : > { %v511_v48 = vadd.f32 %v510_v46, %v489_v47 }
  0xc1   : > { %514 = vst [vmem:[%s188_s10 + $0x8] sm:$0xff] %v511_v48 }
  0xc2   : > { %709 = shalt.err (!%p706_p5)
}
  0xc3   : > { %625 = dma.vmem_to_hbm [thread:$0]  (%p823_p4), %s532_s23, 256, %s534_s26, %s516_s27  }
  0xc4 PF: > { %p631_p6 = scmp.ge.s32.totalorder %s760_s17, 2  ;;  %s545_s7 = sand.u32 1, %s740_s12  }
  0xc5   : > { %s546_s8 = scalar_lea.sflag [#allocation3], %s545_s7 }
  0xc6   : > { %p628_p7 = pnand %p631_p6, %p830_p8 }
  0xc8   : > { %p629_p9 = pneg %p628_p7 }
  0xca   : > { %735 = dma.done.wait (%p629_p9), %s546_s8, 256  }
  0xcb   : > { %737 = vsyncadd (%p629_p9), %s546_s8, 4294967040  ;;  %s16_s17 = sadd.s32 1, %s760_s17   ;;  %s892_s12 = smov %s744_s13 }
  0xcc   : > { %p13_p10 = scmp.ge.s32.totalorder %s16_s17, 4   ;;  %s893_s13 = smov %s748_s14 }
  0xcd   : > { %s894_s14 = smov %s836_s25  ;;  %s895_s15 = smov %s756_s16 }
  0xce   : > { %s896_s16 = smov %s898_s20  ;;  %15 = sbr.rel (!%p13_p10) target bundleno = 4 (0x4), region = 67 }
  0xd3   :  { %552 = vsyncpa [#allocation3], 1 }
  0xd4   :  { %554 = vsyncpa [#allocation3 + $0x1], 1 }

</bundles_post_ra>
